<compile_context>
chip_gen: v5e
topology: v5e:2x2
jax: 0.10.0
libtpu: 0.0.40
codegen_flags: <defaults>
</compile_context>

<pallas_src>
import functools

import jax
import jax.numpy as jnp
from jax import lax
from jax.experimental import pallas as pl
from jax.experimental.pallas import tpu as pltpu  # noqa: F401  (TPU backend)


# ---------------------------------------------------------------------------
# Fused kernel: adaptive-gaussian init + DEQ fixed point + classifier head
# ---------------------------------------------------------------------------
def fused_deq_kernel(x_ref, noise_ref, wx_ref, wz_ref, b_ref, wc_ref, bc_ref,
                     pool_ref, zs_ref, y_ref, *, n_iters, batch, seq):
    B, M = batch, seq
    xf = x_ref[...]                                   # (B*M, Dx)
    nf = noise_ref[...]                               # (B*M, Dz)

    # ---- initialization_func (gaussian, adaptive) --------------------------
    # Per-batch masked mean/std over the sequence axis (rows whose L1 is 0 are
    # treated as padding), then z0 = randn * std + mean.
    z0_parts = []
    for bi in range(B):                               # B is small and static
        lo = bi * M
        xb = xf[lo:lo + M, :]                         # (M, Dx) aligned slice
        nb = nf[lo:lo + M, :]
        row_l1 = jnp.sum(jnp.abs(xb), axis=-1, keepdims=True)          # (M, 1)
        valid = (row_l1 > 0.0).astype(jnp.float32)
        cnt = jnp.maximum(jnp.sum(valid, axis=0, keepdims=True), 1.0)  # (1, 1)
        inv_cnt = pl.reciprocal(cnt, approx=True)
        mean = jnp.sum(xb * valid, axis=0, keepdims=True) * inv_cnt    # (1, D)
        centered = (xb - mean) * valid
        inv_nm1 = pl.reciprocal(jnp.maximum(cnt - 1.0, 1.0), approx=True)
        var = jnp.sum(centered * centered, axis=0, keepdims=True) * inv_nm1
        std = jnp.sqrt(var)
        z0_parts.append(nb * std + mean)              # (M, Dz)
    z = jnp.concatenate(z0_parts, axis=0) if B > 1 else z0_parts[0]  # (B*M, Dz)

    # ---- DEQ fixed-point solve ---------------------------------------------
    # Injection computed once: u = x @ Wx + b ; then z <- tanh(z @ Wz + u).
    u = jnp.dot(xf, wx_ref[...], preferred_element_type=jnp.float32) + b_ref[...]
    wz = wz_ref[...]

    def body(_, zc):
        return jnp.tanh(jnp.dot(zc, wz, preferred_element_type=jnp.float32) + u)

    z_star = lax.fori_loop(0, n_iters, body, z, unroll=True)          # (B*M, Dz)
    zs_ref[...] = z_star

    # ---- classifier: mean-pool over sequence (MXU) + linear ---------------
    pooled = jnp.dot(pool_ref[...], z_star,
                     preferred_element_type=jnp.float32)              # (B, Dz)
    y_ref[...] = jnp.dot(pooled, wc_ref[...],
                         preferred_element_type=jnp.float32) + bc_ref[...]


def pallas_deq_forward(x, noise, wx, wz, b, wc, bc, *, n_iters):
    """Single pallas_call for the whole forward pass."""
    B, M, Dx = x.shape
    Dz = wz.shape[0]
    C = wc.shape[-1]

    x_flat = x.reshape(B * M, Dx).astype(jnp.float32)
    noise_flat = noise.reshape(B * M, Dz).astype(jnp.float32)
    # (B, B*M) mean-pool matrix: row b averages rows b*M .. (b+1)*M - 1.
    pool = jnp.repeat(jnp.eye(B, dtype=jnp.float32), M, axis=1) / float(M)

    kernel = functools.partial(fused_deq_kernel, n_iters=n_iters, batch=B, seq=M)
    z_flat, y = pl.pallas_call(
        kernel,
        out_shape=(
            jax.ShapeDtypeStruct((B * M, Dz), jnp.float32),
            jax.ShapeDtypeStruct((B, C), jnp.float32),
        ),
    )(x_flat, noise_flat, wx, wz, b, wc, bc, pool)
    return z_flat.reshape(B, M, Dz), y


# ---------------------------------------------------------------------------
# Model wrapper mirroring TorchDEQModel.forward
# ---------------------------------------------------------------------------
class TorchDEQModelPallas:
    def __init__(self, d_z=8, d_x=8, n_classes=10, n_iters=16, key=None):
        assert d_z == d_x, "adaptive_gaussian init requires d == p (d_x == d_z)"
        self.d_z, self.d_x, self.n_classes, self.n_iters = d_z, d_x, n_classes, n_iters
        key = jax.random.PRNGKey(0) if key is None else key
        k_wx, k_wz, k_b, k_wc, _ = jax.random.split(key, 5)
        # deq_model params (contractive so the fixed-point iteration converges)
        self.wx = (jax.random.normal(k_wx, (d_x, d_z), jnp.float32)
                   / jnp.sqrt(d_x))
        self.wz = (jax.random.normal(k_wz, (d_z, d_z), jnp.float32)
                   * (0.5 / jnp.sqrt(d_z)))
        self.b = jax.random.normal(k_b, (1, d_z), jnp.float32) * 0.1
        # classifier params
        self.wc = (jax.random.normal(k_wc, (d_z, n_classes), jnp.float32)
                   / jnp.sqrt(d_z))
        self.bc = jnp.zeros((1, n_classes), jnp.float32)

    def forward(self, x, noise):
        z_star, y = pallas_deq_forward(
            x, noise, self.wx, self.wz, self.b, self.wc, self.bc,
            n_iters=self.n_iters)
        info = {"nstep": jnp.asarray(self.n_iters, jnp.int32)}
        return z_star, info, y


# ---------------------------------------------------------------------------
if __name__ == "__main__":
    B, M, D, C = 2, 16, 8, 10          # batch, seq, feature (d_x == d_z), classes

    key = jax.random.PRNGKey(0)
    k_x, k_noise, k_params = jax.random.split(key, 3)

    x = jax.random.normal(k_x, (B, M, D), jnp.float32)
    # simulate padding: zero out the last 4 sequence positions of batch 1
    x = x.at[1, M - 4:, :].set(0.0)
    noise = jax.random.normal(k_noise, (B, M, D), jnp.float32)

    model = TorchDEQModelPallas(d_z=D, d_x=D, n_classes=C, n_iters=16,
                                key=k_params)
    z_star, info, y = model.forward(x, noise)

    jax.block_until_ready(z_star)
    jax.block_until_ready(y)

    assert z_star.shape == (B, M, D)
    assert y.shape == (B, C)
    assert bool(jnp.all(jnp.isfinite(z_star))) and bool(jnp.all(jnp.isfinite(y)))
    print("KERNEL_OK")
</pallas_src>

<mosaic_0001>
module attributes {stable_mosaic.version = 11 : i64} {
  func.func @fused_deq_kernel(%arg0: memref<32x8xf32, #tpu.memory_space<vmem>>, %arg1: memref<32x8xf32, #tpu.memory_space<vmem>>, %arg2: memref<8x8xf32, #tpu.memory_space<vmem>>, %arg3: memref<8x8xf32, #tpu.memory_space<vmem>>, %arg4: memref<1x8xf32, #tpu.memory_space<vmem>>, %arg5: memref<8x10xf32, #tpu.memory_space<vmem>>, %arg6: memref<1x10xf32, #tpu.memory_space<vmem>>, %arg7: memref<2x32xf32, #tpu.memory_space<vmem>>, %arg8: memref<32x8xf32, #tpu.memory_space<vmem>>, %arg9: memref<2x10xf32, #tpu.memory_space<vmem>>) attributes {dimension_semantics = [], scalar_prefetch = 0 : i64, scratch_operands = 0 : i64, tpu.core_type = #tpu.core_type<tc>} {
    %c0 = arith.constant 0 : index
    %c0_0 = arith.constant 0 : index
    %0 = vector.load %arg0[%c0, %c0_0] : memref<32x8xf32, #tpu.memory_space<vmem>>, vector<32x8xf32>
    %c0_1 = arith.constant 0 : index
    %c0_2 = arith.constant 0 : index
    %1 = vector.load %arg1[%c0_1, %c0_2] : memref<32x8xf32, #tpu.memory_space<vmem>>, vector<32x8xf32>
    %2 = vector.extract_strided_slice %0 {offsets = [0, 0], sizes = [16, 8], strides = [1, 1]} : vector<32x8xf32> to vector<16x8xf32>
    %3 = vector.extract_strided_slice %1 {offsets = [0, 0], sizes = [16, 8], strides = [1, 1]} : vector<32x8xf32> to vector<16x8xf32>
    %4 = math.absf %2 : vector<16x8xf32>
    %cst = arith.constant dense<0.000000e+00> : vector<16xf32>
    %5 = vector.multi_reduction <add>, %4, %cst [1] : vector<16x8xf32> to vector<16xf32>
    %6 = vector.shape_cast %5 : vector<16xf32> to vector<16x1xf32>
    %cst_3 = arith.constant 0.000000e+00 : f32
    %7 = vector.broadcast %cst_3 : f32 to vector<16x1xf32>
    %8 = arith.cmpf ogt, %6, %7 : vector<16x1xf32>
    %9 = arith.extui %8 : vector<16x1xi1> to vector<16x1xi32>
    %10 = arith.sitofp %9 : vector<16x1xi32> to vector<16x1xf32>
    %cst_4 = arith.constant dense<0.000000e+00> : vector<1xf32>
    %11 = vector.multi_reduction <add>, %10, %cst_4 [0] : vector<16x1xf32> to vector<1xf32>
    %12 = vector.shape_cast %11 : vector<1xf32> to vector<1x1xf32>
    %cst_5 = arith.constant 1.000000e+00 : f32
    %13 = vector.broadcast %cst_5 : f32 to vector<1x1xf32>
    %14 = arith.maximumf %12, %13 : vector<1x1xf32>
    %15 = tpu.reciprocal %14 {approx = true} : vector<1x1xf32> -> vector<1x1xf32>
    %16 = vector.broadcast %10 : vector<16x1xf32> to vector<16x8xf32>
    %17 = arith.mulf %2, %16 : vector<16x8xf32>
    %cst_6 = arith.constant dense<0.000000e+00> : vector<8xf32>
    %18 = vector.multi_reduction <add>, %17, %cst_6 [0] : vector<16x8xf32> to vector<8xf32>
    %19 = vector.shape_cast %18 : vector<8xf32> to vector<1x8xf32>
    %20 = vector.broadcast %15 : vector<1x1xf32> to vector<1x8xf32>
    %21 = arith.mulf %19, %20 : vector<1x8xf32>
    %22 = vector.broadcast %21 : vector<1x8xf32> to vector<16x8xf32>
    %23 = arith.subf %2, %22 : vector<16x8xf32>
    %24 = vector.broadcast %10 : vector<16x1xf32> to vector<16x8xf32>
    %25 = arith.mulf %23, %24 : vector<16x8xf32>
    %cst_7 = arith.constant 1.000000e+00 : f32
    %26 = vector.broadcast %cst_7 : f32 to vector<1x1xf32>
    %27 = arith.subf %14, %26 : vector<1x1xf32>
    %cst_8 = arith.constant 1.000000e+00 : f32
    %28 = vector.broadcast %cst_8 : f32 to vector<1x1xf32>
    %29 = arith.maximumf %27, %28 : vector<1x1xf32>
    %30 = tpu.reciprocal %29 {approx = true} : vector<1x1xf32> -> vector<1x1xf32>
    %31 = arith.mulf %25, %25 : vector<16x8xf32>
    %cst_9 = arith.constant dense<0.000000e+00> : vector<8xf32>
    %32 = vector.multi_reduction <add>, %31, %cst_9 [0] : vector<16x8xf32> to vector<8xf32>
    %33 = vector.shape_cast %32 : vector<8xf32> to vector<1x8xf32>
    %34 = vector.broadcast %30 : vector<1x1xf32> to vector<1x8xf32>
    %35 = arith.mulf %33, %34 : vector<1x8xf32>
    %36 = math.sqrt %35 : vector<1x8xf32>
    %37 = vector.broadcast %36 : vector<1x8xf32> to vector<16x8xf32>
    %38 = arith.mulf %3, %37 : vector<16x8xf32>
    %39 = vector.broadcast %21 : vector<1x8xf32> to vector<16x8xf32>
    %40 = arith.addf %38, %39 : vector<16x8xf32>
    %41 = vector.extract_strided_slice %0 {offsets = [16, 0], sizes = [16, 8], strides = [1, 1]} : vector<32x8xf32> to vector<16x8xf32>
    %42 = vector.extract_strided_slice %1 {offsets = [16, 0], sizes = [16, 8], strides = [1, 1]} : vector<32x8xf32> to vector<16x8xf32>
    %43 = math.absf %41 : vector<16x8xf32>
    %cst_10 = arith.constant dense<0.000000e+00> : vector<16xf32>
    %44 = vector.multi_reduction <add>, %43, %cst_10 [1] : vector<16x8xf32> to vector<16xf32>
    %45 = vector.shape_cast %44 : vector<16xf32> to vector<16x1xf32>
    %cst_11 = arith.constant 0.000000e+00 : f32
    %46 = vector.broadcast %cst_11 : f32 to vector<16x1xf32>
    %47 = arith.cmpf ogt, %45, %46 : vector<16x1xf32>
    %48 = arith.extui %47 : vector<16x1xi1> to vector<16x1xi32>
    %49 = arith.sitofp %48 : vector<16x1xi32> to vector<16x1xf32>
    %cst_12 = arith.constant dense<0.000000e+00> : vector<1xf32>
    %50 = vector.multi_reduction <add>, %49, %cst_12 [0] : vector<16x1xf32> to vector<1xf32>
    %51 = vector.shape_cast %50 : vector<1xf32> to vector<1x1xf32>
    %cst_13 = arith.constant 1.000000e+00 : f32
    %52 = vector.broadcast %cst_13 : f32 to vector<1x1xf32>
    %53 = arith.maximumf %51, %52 : vector<1x1xf32>
    %54 = tpu.reciprocal %53 {approx = true} : vector<1x1xf32> -> vector<1x1xf32>
    %55 = vector.broadcast %49 : vector<16x1xf32> to vector<16x8xf32>
    %56 = arith.mulf %41, %55 : vector<16x8xf32>
    %cst_14 = arith.constant dense<0.000000e+00> : vector<8xf32>
    %57 = vector.multi_reduction <add>, %56, %cst_14 [0] : vector<16x8xf32> to vector<8xf32>
    %58 = vector.shape_cast %57 : vector<8xf32> to vector<1x8xf32>
    %59 = vector.broadcast %54 : vector<1x1xf32> to vector<1x8xf32>
    %60 = arith.mulf %58, %59 : vector<1x8xf32>
    %61 = vector.broadcast %60 : vector<1x8xf32> to vector<16x8xf32>
    %62 = arith.subf %41, %61 : vector<16x8xf32>
    %63 = vector.broadcast %49 : vector<16x1xf32> to vector<16x8xf32>
    %64 = arith.mulf %62, %63 : vector<16x8xf32>
    %cst_15 = arith.constant 1.000000e+00 : f32
    %65 = vector.broadcast %cst_15 : f32 to vector<1x1xf32>
    %66 = arith.subf %53, %65 : vector<1x1xf32>
    %cst_16 = arith.constant 1.000000e+00 : f32
    %67 = vector.broadcast %cst_16 : f32 to vector<1x1xf32>
    %68 = arith.maximumf %66, %67 : vector<1x1xf32>
    %69 = tpu.reciprocal %68 {approx = true} : vector<1x1xf32> -> vector<1x1xf32>
    %70 = arith.mulf %64, %64 : vector<16x8xf32>
    %cst_17 = arith.constant dense<0.000000e+00> : vector<8xf32>
    %71 = vector.multi_reduction <add>, %70, %cst_17 [0] : vector<16x8xf32> to vector<8xf32>
    %72 = vector.shape_cast %71 : vector<8xf32> to vector<1x8xf32>
    %73 = vector.broadcast %69 : vector<1x1xf32> to vector<1x8xf32>
    %74 = arith.mulf %72, %73 : vector<1x8xf32>
    %75 = math.sqrt %74 : vector<1x8xf32>
    %76 = vector.broadcast %75 : vector<1x8xf32> to vector<16x8xf32>
    %77 = arith.mulf %42, %76 : vector<16x8xf32>
    %78 = vector.broadcast %60 : vector<1x8xf32> to vector<16x8xf32>
    %79 = arith.addf %77, %78 : vector<16x8xf32>
    %80 = tpu.concatenate %40, %79 in 0 : vector<16x8xf32>, vector<16x8xf32> -> vector<32x8xf32>
    %c0_18 = arith.constant 0 : index
    %c0_19 = arith.constant 0 : index
    %81 = vector.load %arg2[%c0_18, %c0_19] : memref<8x8xf32, #tpu.memory_space<vmem>>, vector<8x8xf32>
    %cst_20 = arith.constant dense<0.000000e+00> : vector<32x8xf32>
    %82 = tpu.matmul %0, %81, %cst_20 {dimension_numbers = #tpu.dot_dimension_numbers<[1], [0], [0], [1], [0, 0, 1, 1], [], []>} : vector<32x8xf32>, vector<8x8xf32>, vector<32x8xf32> -> vector<32x8xf32>
    %c0_21 = arith.constant 0 : index
    %c0_22 = arith.constant 0 : index
    %83 = vector.load %arg4[%c0_21, %c0_22] : memref<1x8xf32, #tpu.memory_space<vmem>>, vector<1x8xf32>
    %84 = vector.broadcast %83 : vector<1x8xf32> to vector<32x8xf32>
    %85 = arith.addf %82, %84 : vector<32x8xf32>
    %c0_23 = arith.constant 0 : index
    %c0_24 = arith.constant 0 : index
    %86 = vector.load %arg3[%c0_23, %c0_24] : memref<8x8xf32, #tpu.memory_space<vmem>>, vector<8x8xf32>
    %c0_i32 = arith.constant 0 : i32
    %cst_25 = arith.constant dense<0.000000e+00> : vector<32x8xf32>
    %87 = tpu.matmul %80, %86, %cst_25 {dimension_numbers = #tpu.dot_dimension_numbers<[1], [0], [0], [1], [0, 0, 1, 1], [], []>} : vector<32x8xf32>, vector<8x8xf32>, vector<32x8xf32> -> vector<32x8xf32>
    %88 = arith.addf %87, %85 : vector<32x8xf32>
    %89 = math.tanh %88 : vector<32x8xf32>
    %c1_i32 = arith.constant 1 : i32
    %cst_26 = arith.constant dense<0.000000e+00> : vector<32x8xf32>
    %90 = tpu.matmul %89, %86, %cst_26 {dimension_numbers = #tpu.dot_dimension_numbers<[1], [0], [0], [1], [0, 0, 1, 1], [], []>} : vector<32x8xf32>, vector<8x8xf32>, vector<32x8xf32> -> vector<32x8xf32>
    %91 = arith.addf %90, %85 : vector<32x8xf32>
    %92 = math.tanh %91 : vector<32x8xf32>
    %c2_i32 = arith.constant 2 : i32
    %cst_27 = arith.constant dense<0.000000e+00> : vector<32x8xf32>
    %93 = tpu.matmul %92, %86, %cst_27 {dimension_numbers = #tpu.dot_dimension_numbers<[1], [0], [0], [1], [0, 0, 1, 1], [], []>} : vector<32x8xf32>, vector<8x8xf32>, vector<32x8xf32> -> vector<32x8xf32>
    %94 = arith.addf %93, %85 : vector<32x8xf32>
    %95 = math.tanh %94 : vector<32x8xf32>
    %c3_i32 = arith.constant 3 : i32
    %cst_28 = arith.constant dense<0.000000e+00> : vector<32x8xf32>
    %96 = tpu.matmul %95, %86, %cst_28 {dimension_numbers = #tpu.dot_dimension_numbers<[1], [0], [0], [1], [0, 0, 1, 1], [], []>} : vector<32x8xf32>, vector<8x8xf32>, vector<32x8xf32> -> vector<32x8xf32>
    %97 = arith.addf %96, %85 : vector<32x8xf32>
    %98 = math.tanh %97 : vector<32x8xf32>
    %c4_i32 = arith.constant 4 : i32
    %cst_29 = arith.constant dense<0.000000e+00> : vector<32x8xf32>
    %99 = tpu.matmul %98, %86, %cst_29 {dimension_numbers = #tpu.dot_dimension_numbers<[1], [0], [0], [1], [0, 0, 1, 1], [], []>} : vector<32x8xf32>, vector<8x8xf32>, vector<32x8xf32> -> vector<32x8xf32>
    %100 = arith.addf %99, %85 : vector<32x8xf32>
    %101 = math.tanh %100 : vector<32x8xf32>
    %c5_i32 = arith.constant 5 : i32
    %cst_30 = arith.constant dense<0.000000e+00> : vector<32x8xf32>
    %102 = tpu.matmul %101, %86, %cst_30 {dimension_numbers = #tpu.dot_dimension_numbers<[1], [0], [0], [1], [0, 0, 1, 1], [], []>} : vector<32x8xf32>, vector<8x8xf32>, vector<32x8xf32> -> vector<32x8xf32>
    %103 = arith.addf %102, %85 : vector<32x8xf32>
    %104 = math.tanh %103 : vector<32x8xf32>
    %c6_i32 = arith.constant 6 : i32
    %cst_31 = arith.constant dense<0.000000e+00> : vector<32x8xf32>
    %105 = tpu.matmul %104, %86, %cst_31 {dimension_numbers = #tpu.dot_dimension_numbers<[1], [0], [0], [1], [0, 0, 1, 1], [], []>} : vector<32x8xf32>, vector<8x8xf32>, vector<32x8xf32> -> vector<32x8xf32>
    %106 = arith.addf %105, %85 : vector<32x8xf32>
    %107 = math.tanh %106 : vector<32x8xf32>
    %c7_i32 = arith.constant 7 : i32
    %cst_32 = arith.constant dense<0.000000e+00> : vector<32x8xf32>
    %108 = tpu.matmul %107, %86, %cst_32 {dimension_numbers = #tpu.dot_dimension_numbers<[1], [0], [0], [1], [0, 0, 1, 1], [], []>} : vector<32x8xf32>, vector<8x8xf32>, vector<32x8xf32> -> vector<32x8xf32>
    %109 = arith.addf %108, %85 : vector<32x8xf32>
    %110 = math.tanh %109 : vector<32x8xf32>
    %c8_i32 = arith.constant 8 : i32
    %cst_33 = arith.constant dense<0.000000e+00> : vector<32x8xf32>
    %111 = tpu.matmul %110, %86, %cst_33 {dimension_numbers = #tpu.dot_dimension_numbers<[1], [0], [0], [1], [0, 0, 1, 1], [], []>} : vector<32x8xf32>, vector<8x8xf32>, vector<32x8xf32> -> vector<32x8xf32>
    %112 = arith.addf %111, %85 : vector<32x8xf32>
    %113 = math.tanh %112 : vector<32x8xf32>
    %c9_i32 = arith.constant 9 : i32
    %cst_34 = arith.constant dense<0.000000e+00> : vector<32x8xf32>
    %114 = tpu.matmul %113, %86, %cst_34 {dimension_numbers = #tpu.dot_dimension_numbers<[1], [0], [0], [1], [0, 0, 1, 1], [], []>} : vector<32x8xf32>, vector<8x8xf32>, vector<32x8xf32> -> vector<32x8xf32>
    %115 = arith.addf %114, %85 : vector<32x8xf32>
    %116 = math.tanh %115 : vector<32x8xf32>
    %c10_i32 = arith.constant 10 : i32
    %cst_35 = arith.constant dense<0.000000e+00> : vector<32x8xf32>
    %117 = tpu.matmul %116, %86, %cst_35 {dimension_numbers = #tpu.dot_dimension_numbers<[1], [0], [0], [1], [0, 0, 1, 1], [], []>} : vector<32x8xf32>, vector<8x8xf32>, vector<32x8xf32> -> vector<32x8xf32>
    %118 = arith.addf %117, %85 : vector<32x8xf32>
    %119 = math.tanh %118 : vector<32x8xf32>
    %c11_i32 = arith.constant 11 : i32
    %cst_36 = arith.constant dense<0.000000e+00> : vector<32x8xf32>
    %120 = tpu.matmul %119, %86, %cst_36 {dimension_numbers = #tpu.dot_dimension_numbers<[1], [0], [0], [1], [0, 0, 1, 1], [], []>} : vector<32x8xf32>, vector<8x8xf32>, vector<32x8xf32> -> vector<32x8xf32>
    %121 = arith.addf %120, %85 : vector<32x8xf32>
    %122 = math.tanh %121 : vector<32x8xf32>
    %c12_i32 = arith.constant 12 : i32
    %cst_37 = arith.constant dense<0.000000e+00> : vector<32x8xf32>
    %123 = tpu.matmul %122, %86, %cst_37 {dimension_numbers = #tpu.dot_dimension_numbers<[1], [0], [0], [1], [0, 0, 1, 1], [], []>} : vector<32x8xf32>, vector<8x8xf32>, vector<32x8xf32> -> vector<32x8xf32>
    %124 = arith.addf %123, %85 : vector<32x8xf32>
    %125 = math.tanh %124 : vector<32x8xf32>
    %c13_i32 = arith.constant 13 : i32
    %cst_38 = arith.constant dense<0.000000e+00> : vector<32x8xf32>
    %126 = tpu.matmul %125, %86, %cst_38 {dimension_numbers = #tpu.dot_dimension_numbers<[1], [0], [0], [1], [0, 0, 1, 1], [], []>} : vector<32x8xf32>, vector<8x8xf32>, vector<32x8xf32> -> vector<32x8xf32>
    %127 = arith.addf %126, %85 : vector<32x8xf32>
    %128 = math.tanh %127 : vector<32x8xf32>
    %c14_i32 = arith.constant 14 : i32
    %cst_39 = arith.constant dense<0.000000e+00> : vector<32x8xf32>
    %129 = tpu.matmul %128, %86, %cst_39 {dimension_numbers = #tpu.dot_dimension_numbers<[1], [0], [0], [1], [0, 0, 1, 1], [], []>} : vector<32x8xf32>, vector<8x8xf32>, vector<32x8xf32> -> vector<32x8xf32>
    %130 = arith.addf %129, %85 : vector<32x8xf32>
    %131 = math.tanh %130 : vector<32x8xf32>
    %c15_i32 = arith.constant 15 : i32
    %cst_40 = arith.constant dense<0.000000e+00> : vector<32x8xf32>
    %132 = tpu.matmul %131, %86, %cst_40 {dimension_numbers = #tpu.dot_dimension_numbers<[1], [0], [0], [1], [0, 0, 1, 1], [], []>} : vector<32x8xf32>, vector<8x8xf32>, vector<32x8xf32> -> vector<32x8xf32>
    %133 = arith.addf %132, %85 : vector<32x8xf32>
    %134 = math.tanh %133 : vector<32x8xf32>
    %c0_41 = arith.constant 0 : index
    %c0_42 = arith.constant 0 : index
    %135 = vector.load %arg8[%c0_41, %c0_42] : memref<32x8xf32, #tpu.memory_space<vmem>>, vector<32x8xf32>
    tpu.vector_store %arg8[%c0_41, %c0_42], %134 {strides = array<i32>} : memref<32x8xf32, #tpu.memory_space<vmem>>, vector<32x8xf32>,
    %c0_43 = arith.constant 0 : index
    %c0_44 = arith.constant 0 : index
    %136 = vector.load %arg7[%c0_43, %c0_44] : memref<2x32xf32, #tpu.memory_space<vmem>>, vector<2x32xf32>
    %cst_45 = arith.constant dense<0.000000e+00> : vector<2x8xf32>
    %137 = tpu.matmul %136, %134, %cst_45 {dimension_numbers = #tpu.dot_dimension_numbers<[1], [0], [0], [1], [0, 0, 1, 1], [], []>} : vector<2x32xf32>, vector<32x8xf32>, vector<2x8xf32> -> vector<2x8xf32>
    %c0_46 = arith.constant 0 : index
    %c0_47 = arith.constant 0 : index
    %138 = vector.load %arg5[%c0_46, %c0_47] : memref<8x10xf32, #tpu.memory_space<vmem>>, vector<8x10xf32>
    %cst_48 = arith.constant dense<0.000000e+00> : vector<2x10xf32>
    %139 = tpu.matmul %137, %138, %cst_48 {dimension_numbers = #tpu.dot_dimension_numbers<[1], [0], [0], [1], [0, 0, 1, 1], [], []>} : vector<2x8xf32>, vector<8x10xf32>, vector<2x10xf32> -> vector<2x10xf32>
    %c0_49 = arith.constant 0 : index
    %c0_50 = arith.constant 0 : index
    %140 = vector.load %arg6[%c0_49, %c0_50] : memref<1x10xf32, #tpu.memory_space<vmem>>, vector<1x10xf32>
    %141 = vector.broadcast %140 : vector<1x10xf32> to vector<2x10xf32>
    %142 = arith.addf %139, %141 : vector<2x10xf32>
    %c0_51 = arith.constant 0 : index
    %c0_52 = arith.constant 0 : index
    %143 = vector.load %arg9[%c0_51, %c0_52] : memref<2x10xf32, #tpu.memory_space<vmem>>, vector<2x10xf32>
    tpu.vector_store %arg9[%c0_51, %c0_52], %142 {strides = array<i32>} : memref<2x10xf32, #tpu.memory_space<vmem>>, vector<2x10xf32>,
    return
  }
}

</mosaic_0001>

<bundles_post_ra>
// kernel: tpu_custom_call.1
= control target key start
LH: loop header
LB: loop body
LE: loop exit
PB: predicated region body
PF: predicated region fallthrough
CT: control target
= control target key end

     0   :  { %vm42_vm0 = vcmask 64512   ;;  %s1614_s0 = inlined_call_operand.vmem [shape: f32[32,8], index: 0, kind: input, shape index: {}]   ;;  %s1615_s1 = inlined_call_operand.vmem [shape: f32[32,8], index: 1, kind: input, shape index: {}]   ;;  %s1616_s2 = inlined_call_operand.vmem [shape: f32[8,8], index: 2, kind: input, shape index: {}]   ;;  %s1617_s3 = inlined_call_operand.vmem [shape: f32[8,8], index: 3, kind: input, shape index: {}]   ;;  %s1618_s4 = inlined_call_operand.vmem [shape: f32[1,8], index: 4, kind: input, shape index: {}]   ;;  %s1619_s5 = inlined_call_operand.vmem [shape: f32[8,10], index: 5, kind: input, shape index: {}]   ;;  %s1620_s6 = inlined_call_operand.vmem [shape: f32[1,10], index: 6, kind: input, shape index: {}]   ;;  %s1621_s7 = inlined_call_operand.vmem [shape: f32[2,32], index: 7, kind: input, shape index: {}]   ;;  %s1622_s8 = inlined_call_operand.vmem [shape: f32[32,8], index: 8, kind: output, shape index: {0}]   ;;  %s1623_s9 = inlined_call_operand.hbm [shape: f32[2,10], index: 9, kind: output, shape index: {1}]  }
   0x1   :  { %v1329_v0 = vld [vmem:[%s1614_s0 + $0x10] sm:$0xff]  ;;  %v1334_v1 = vld [vmem:[%s1614_s0] sm:$0xff]  ;;  %v1341_v4 = vld [vmem:[%s1614_s0 + $0x18] sm:$0xff] }
   0x2   :  { %v111_v2 = vand.u32 2147483647, %v1329_v0  ;;  %v40_v3 = vand.u32 2147483647, %v1334_v1  ;;  %v1346_v5 = vld [vmem:[%s1614_s0 + $0x8] sm:$0xff] }
   0x4   :  { %v113_v6 = vsel %vm42_vm0, %v111_v2, 0.0  ;;  %v43_v7 = vsel %vm42_vm0, %v40_v3, 0.0 }
   0x5   :  { %114 = vadd.xlane.f32.xlu1 %v113_v6  ;;  %44 = vadd.xlane.f32.xlu0 %v43_v7 }
   0x6   :  { %15 = vsyncpa [#allocation3], 0  ;;  %v112_v8 = vand.u32 2147483647, %v1341_v4  ;;  %v41_v9 = vand.u32 2147483647, %v1346_v5 }
   0x7   :  { %v1274_v14 = vmov 0.0   ;;  %v181_v55 = vld [vmem:[%s1616_s2] sm:$0xff]  ;;  %vm953_vm9 = vcmask 261120   ;;  %s1275_s17 = smov [#allocation2]   ;;  %s1016_s2 = sshll.u32 %s1623_s9, 4  ;;  %vm1005_vm10 = vcmask 74752   ;;  %s1017_s2 = int_to_ptr.hbm [resolvable:$true] %s1016_s2 }
   0x8   :  { %v116_v10 = vsel %vm42_vm0, %v112_v8, 0.0  ;;  %v46_v11 = vsel %vm42_vm0, %v41_v9, 0.0  ;;  %v1384_v56 = vld [vmem:[%s1617_s3] sm:$0xff]  ;;  %213 = vmatpush.msra.mxu0 %v181_v55  ;;  %1103 = vmatpush.msra.mxu3 %v181_v55  ;;  %s1014_s18 = sshll.u32 %s1275_s17, 4  ;;  %s1015_s18 = int_to_ptr.vmem [resolvable:$true] %s1014_s18 }
   0x9   :  { %255 = vmatpush.msra.mxu1 %v1384_v56  ;;  %1033 = vmatmul.msk.f32.vlgmr.msra.gmra.mxu0 %vm42_vm0, %v1334_v1 }
   0xa   :  { %1035 = vmatmul.msk.f32.vlgmr.msra.gmra.mxu3 %vm42_vm0, %v1329_v0  ;;  %300 = vmatpush.msra.mxu2 %v1384_v56 }
   0xb   :  { %345 = vmatpush.msrb.mxu3 %v1384_v56  ;;  %390 = vmatpush.msrb.mxu0 %v1384_v56 }
   0xc   :  { %435 = vmatpush.msrb.mxu1 %v1384_v56  ;;  %480 = vmatpush.msrb.mxu2 %v1384_v56 }
   0xd   :  { %117 = vadd.xlane.f32.xlu1 %v116_v10  ;;  %47 = vadd.xlane.f32.xlu0 %v46_v11 }
   0xe   :  { %525 = vmatpush.msra.mxu3 %v1384_v56  ;;  %570 = vmatpush.msra.mxu0 %v1384_v56 }
  0x11   :  { %1034 = vmatmul.msk.f32.gmra.mxu0 %vm42_vm0, %v1346_v5 }
  0x12   :  { %1036 = vmatmul.msk.f32.gmra.mxu3 %vm42_vm0, %v1341_v4 }
  0x78   :  { %v115_v12 = vpop.xlane.xlu1 %114  ;;  %v45_v13 = vpop.xlane.xlu0 %44 }
  0x79   :  { %vm119_vm1 = vcmp.gt.f32.partialorder %v115_v12, 0.0  ;;  %vm49_vm2 = vcmp.gt.f32.partialorder %v45_v13, 0.0 }
  0x7a   :  { %v1354_v15 = vsel %vm119_vm1, 1.0, %v1274_v14  ;;  %v1356_v16 = vsel %vm49_vm2, 1.0, %v1274_v14 }
  0x7b   :  { %v134_v17 = vmul.f32 %v1354_v15, %v1329_v0  ;;  %v64_v18 = vmul.f32 %v1356_v16, %v1334_v1 }
  0x7d   :  { %v136_v21 = vsel %vm42_vm0, %v134_v17, 0.0  ;;  %v66_v28 = vsel %vm42_vm0, %v64_v18, 0.0 }
  0x80   :  { %v118_v19 = vpop.xlane.xlu1 %117  ;;  %v48_v20 = vpop.xlane.xlu0 %47 }
  0x81   :  { %vm120_vm3 = vcmp.gt.f32.partialorder %v118_v19, 0.0  ;;  %vm50_vm4 = vcmp.gt.f32.partialorder %v48_v20, 0.0 }
  0x82   :  { %v1363_v22 = vsel %vm120_vm3, 1.0, %v1274_v14  ;;  %v1365_v23 = vsel %vm50_vm4, 1.0, %v1274_v14 }
  0x83   :  { %v125_v24 = vadd.f32 %v1363_v22, %v1354_v15  ;;  %v135_v25 = vmul.f32 %v1363_v22, %v1341_v4  ;;  %v55_v26 = vadd.f32 %v1365_v23, %v1356_v16  ;;  %v65_v27 = vmul.f32 %v1365_v23, %v1346_v5 }
  0x85   :  { %v126_v29 = vrot.slane %v125_v24, 4  ;;  %v137_v30 = vsel %vm42_vm0, %v135_v25, 0.0  ;;  %v56_v31 = vrot.slane %v55_v26, 4  ;;  %v67_v32 = vsel %vm42_vm0, %v65_v27, 0.0 }
  0x86   :  { %v138_v33 = vadd.f32 %v137_v30, %v136_v21  ;;  %v68_v34 = vadd.f32 %v67_v32, %v66_v28 }
  0x87   :  { %v127_v35 = vadd.f32 %v126_v29, %v125_v24  ;;  %v57_v36 = vadd.f32 %v56_v31, %v55_v26 }
  0x88   :  { %v139_v37 = vrot.slane %v138_v33, 4  ;;  %v69_v38 = vrot.slane %v68_v34, 4 }
  0x89   :  { %v128_v39 = vrot.slane %v127_v35, 2  ;;  %v58_v40 = vrot.slane %v57_v36, 2 }
  0x8a   :  { %v140_v41 = vadd.f32 %v139_v37, %v138_v33  ;;  %v70_v42 = vadd.f32 %v69_v38, %v68_v34 }
  0x8b   :  { %v129_v43 = vadd.f32 %v128_v39, %v127_v35  ;;  %v59_v44 = vadd.f32 %v58_v40, %v57_v36 }
  0x8c   :  { %v141_v45 = vrot.slane %v140_v41, 2  ;;  %v71_v48 = vrot.slane %v70_v42, 2 }
  0x8d   :  { %v130_v46 = vrot.slane %v129_v43, 1  ;;  %v60_v47 = vrot.slane %v59_v44, 1 }
  0x8e   :  { %v142_v51 = vadd.f32 %v141_v45, %v140_v41  ;;  %v72_v54 = vadd.f32 %v71_v48, %v70_v42 }
  0x8f   :  { %v131_v49 = vadd.f32 %v130_v46, %v129_v43  ;;  %v61_v50 = vadd.f32 %v60_v47, %v59_v44 }
  0x90   :  { %v143_v57 = vrot.slane %v142_v51, 1  ;;  %v73_v58 = vrot.slane %v72_v54, 1 }
  0x91   :  { %v132_v52 = vmax.f32 %v131_v49, 1.0  ;;  %v62_v53 = vmax.f32 %v61_v50, 1.0 }
  0x92   :  { %v144_v59 = vadd.f32 %v143_v57, %v142_v51  ;;  %v74_v61 = vadd.f32 %v73_v58, %v72_v54  ;;  %v36_v51 = vld [vmem:[%s1615_s1] sm:$0xff] }
  0x93   :  { %1108 = vrcp.f32 %v132_v52  ;;  %v1032_v18 = vadd.f32 -1.0, %v132_v52  ;;  %v1029_v20 = vadd.f32 -1.0, %v62_v53 }
  0x94   :  { %1110 = vrcp.f32 %v62_v53 }
  0x95   :  { %v81_v25 = vmax.f32 %v1029_v20, 1.0  ;;  %v221_v20 = vpop.f32.mrf.mxu3 }
  0x99   :  { %v1109_v60 = vpop.eup %1108 }
  0x9a   :  { %v1111_v62 = vpop.eup %1110  ;;  %v1398_v63 = vmul.f32 %v1109_v60, %v144_v59  ;;  %v37_v59 = vld [vmem:[%s1615_s1 + $0x8] sm:$0xff] }
  0x9b   :  { %v1400_v2 = vmul.f32 %v1111_v62, %v74_v61 }
  0x9c   :  { %v146_v3 = vsub.f32 %v1329_v0, %v1398_v63  ;;  %v147_v6 = vsub.f32 %v1341_v4, %v1398_v63 }
  0x9d   :  { %v76_v7 = vsub.f32 %v1334_v1, %v1400_v2  ;;  %v77_v8 = vsub.f32 %v1346_v5, %v1400_v2 }
  0x9e   :  { %v148_v9 = vmul.f32 %v1354_v15, %v146_v3  ;;  %v149_v10 = vmul.f32 %v1363_v22, %v147_v6 }
  0x9f   :  { %v78_v0 = vmul.f32 %v1356_v16, %v76_v7  ;;  %v79_v11 = vmul.f32 %v1365_v23, %v77_v8  ;;  %v151_v16 = vmax.f32 %v1032_v18, 1.0  ;;  %v38_v7 = vld [vmem:[%s1615_s1 + $0x10] sm:$0xff] }
  0xa0   :  { %v153_v12 = vmul.f32 %v148_v9, %v148_v9  ;;  %v154_v13 = vmul.f32 %v149_v10, %v149_v10 }
  0xa1   :  { %v83_v14 = vmul.f32 %v78_v0, %v78_v0  ;;  %v84_v17 = vmul.f32 %v79_v11, %v79_v11  ;;  %1112 = vrcp.f32 %v151_v16  ;;  %v39_v0 = vld [vmem:[%s1615_s1 + $0x18] sm:$0xff] }
  0xa2   :  { %v155_v1 = vsel %vm42_vm0, %v153_v12, 0.0  ;;  %v156_v5 = vsel %vm42_vm0, %v154_v13, 0.0  ;;  %1114 = vrcp.f32 %v81_v25  ;;  %v215_v12 = vpop.f32.mrf.mxu0  ;;  %v1106_v13 = vld [vmem:[%s1618_s4] ss:$0 sm:$0xff] }
  0xa3   :  { %v157_v19 = vadd.f32 %v156_v5, %v155_v1  ;;  %v85_v4 = vsel %vm42_vm0, %v83_v14, 0.0  ;;  %v86_v15 = vsel %vm42_vm0, %v84_v17, 0.0  ;;  %v1446_v14 = vadd.f32 %v1106_v13, %v215_v12 }
  0xa4   :  { %v87_v21 = vadd.f32 %v86_v15, %v85_v4  ;;  %v1454_v15 = vadd.f32 %v1106_v13, %v221_v20 }
  0xa5   :  { %v158_v22 = vrot.slane %v157_v19, 4 }
  0xa6   :  { %v88_v24 = vrot.slane %v87_v21, 4 }
  0xa7   :  { %v159_v23 = vadd.f32 %v158_v22, %v157_v19  ;;  %v1113_v34 = vpop.eup %1112 }
  0xa8   :  { %v89_v26 = vadd.f32 %v88_v24, %v87_v21  ;;  %v1115_v36 = vpop.eup %1114  ;;  %v224_v24 = vpop.f32.mrf.mxu3 }
  0xa9   :  { %v160_v27 = vrot.slane %v159_v23, 2 }
  0xaa   :  { %v90_v28 = vrot.slane %v89_v26, 2  ;;  %v218_v1 = vpop.f32.mrf.mxu0 }
  0xab   :  { %v161_v29 = vadd.f32 %v160_v27, %v159_v23  ;;  %v1449_v5 = vadd.f32 %v1106_v13, %v218_v1  ;;  %v1458_v23 = vadd.f32 %v1106_v13, %v224_v24 }
  0xac   :  { %v91_v30 = vadd.f32 %v90_v28, %v89_v26 }
  0xad   :  { %v162_v31 = vrot.slane %v161_v29, 1 }
  0xae   :  { %v92_v32 = vrot.slane %v91_v30, 1 }
  0xaf   :  { %v163_v33 = vadd.f32 %v162_v31, %v161_v29 }
  0xb0   :  { %v93_v35 = vadd.f32 %v92_v32, %v91_v30 }
  0xb1   :  { %v164_v37 = vmul.f32 %v1113_v34, %v163_v33 }
  0xb2   :  { %v94_v38 = vmul.f32 %v1115_v36, %v93_v35 }
  0xb3   :  { %1116 = vrsqrt.f32 %v164_v37  ;;  %vm172_vm7 = vcmp.eq.f32.partialorder %v164_v37, inf  ;;  %v175_v3 = vand.u32 2147483648, %v164_v37  ;;  %vm174_vm8 = vcmp.eq.f32.partialorder %v164_v37, 0.0 }
  0xb4   :  { %1118 = vrsqrt.f32 %v94_v38  ;;  %vm102_vm5 = vcmp.eq.f32.partialorder %v94_v38, inf  ;;  %v105_v52 = vand.u32 2147483648, %v94_v38  ;;  %vm104_vm6 = vcmp.eq.f32.partialorder %v94_v38, 0.0 }
  0xb9   :  { %v1117_v39 = vpop.eup %1116 }
  0xba   :  { %v1119_v40 = vpop.eup %1118  ;;  %v166_v41 = vmul.f32 %v1117_v39, %v164_v37 }
  0xbb   :  { %v96_v42 = vmul.f32 %v1119_v40, %v94_v38 }
  0xbc   :  { %v167_v44 = vmul.f32 %v1117_v39, %v166_v41 }
  0xbd   :  { %v97_v43 = vmul.f32 %v1119_v40, %v96_v42 }
  0xbe   :  { %v168_v47 = vmul.f32 0.5, %v167_v44 }
  0xbf   :  { %v98_v45 = vmul.f32 0.5, %v97_v43 }
  0xc0   :  { %v169_v50 = vsub.f32 1.5, %v168_v47 }
  0xc1   :  { %v99_v46 = vsub.f32 1.5, %v98_v45 }
  0xc2   :  { %v170_v57 = vmul.f32 %v1117_v39, %v169_v50 }
  0xc3   :  { %v100_v48 = vmul.f32 %v1119_v40, %v99_v46 }
  0xc4   :  { %v171_v60 = vmul.f32 %v170_v57, %v164_v37 }
  0xc5   :  { %v101_v49 = vmul.f32 %v100_v48, %v94_v38 }
  0xc6   :  { %v173_v62 = vsel %vm172_vm7, %v164_v37, %v171_v60 }
  0xc7   :  { %v103_v53 = vsel %vm102_vm5, %v94_v38, %v101_v49  ;;  %v176_v8 = vsel %vm174_vm8, %v175_v3, %v173_v62 }
  0xc8   :  { %v106_v54 = vsel %vm104_vm6, %v105_v52, %v103_v53  ;;  %v177_v9 = vmul.f32 %v176_v8, %v38_v7  ;;  %v178_v11 = vmul.f32 %v176_v8, %v39_v0 }
  0xc9   :  { %v107_v55 = vmul.f32 %v106_v54, %v36_v51  ;;  %v108_v61 = vmul.f32 %v106_v54, %v37_v59 }
  0xca   :  { %v179_v10 = vadd.f32 %v177_v9, %v1398_v63 }
  0xcb   :  { %v109_v58 = vadd.f32 %v107_v55, %v1400_v2  ;;  %v110_v6 = vadd.f32 %v108_v61, %v1400_v2  ;;  %v180_v2 = vadd.f32 %v178_v11, %v1398_v63 }
  0xcd   :  { %1037 = vmatmul.msk.f32.vlgmr.msra.gmra.mxu1 %vm42_vm0, %v109_v58 }
  0xce   :  { %615 = vmatpush.msra.mxu1 %v1384_v56 }
  0xd5   :  { %1038 = vmatmul.msk.f32.gmra.mxu1 %vm42_vm0, %v110_v6 }
  0xdd   :  { %1039 = vmatmul.msk.f32.gmra.mxu1 %vm42_vm0, %v179_v10 }
  0xe5   :  { %1040 = vmatmul.msk.f32.gmra.mxu1 %vm42_vm0, %v180_v2 }
 0x14a   :  { %v257_v17 = vpop.f32.mrf.mxu1 }
 0x14b   :  { %v258_v18 = vadd.f32 %v257_v17, %v1446_v14 }
 0x14d   :  { %1120 = vtanh.f32 %v258_v18 }
 0x152   :  { %v260_v19 = vpop.f32.mrf.mxu1 }
 0x153   :  { %v1121_v4 = vpop.eup %1120  ;;  %v261_v63 = vadd.f32 %v260_v19, %v1449_v5 }
 0x154   :  { %1041 = vmatmul.msk.f32.vlgmr.msra.gmra.mxu2 %vm42_vm0, %v1121_v4 }
 0x155   :  { %1122 = vtanh.f32 %v261_v63  ;;  %660 = vmatpush.msra.mxu2 %v1384_v56 }
 0x15a   :  { %v263_v21 = vpop.f32.mrf.mxu1 }
 0x15b   :  { %v1123_v22 = vpop.eup %1122  ;;  %v264_v16 = vadd.f32 %v263_v21, %v1454_v15 }
 0x15c   :  { %1042 = vmatmul.msk.f32.gmra.mxu2 %vm42_vm0, %v1123_v22 }
 0x15d   :  { %1124 = vtanh.f32 %v264_v16 }
 0x162   :  { %v266_v25 = vpop.f32.mrf.mxu1 }
 0x163   :  { %v1125_v26 = vpop.eup %1124  ;;  %v267_v27 = vadd.f32 %v266_v25, %v1458_v23 }
 0x164   :  { %1043 = vmatmul.msk.f32.gmra.mxu2 %vm42_vm0, %v1125_v26 }
 0x165   :  { %1126 = vtanh.f32 %v267_v27 }
 0x16b   :  { %v1127_v28 = vpop.eup %1126 }
 0x16c   :  { %1044 = vmatmul.msk.f32.gmra.mxu2 %vm42_vm0, %v1127_v28 }
 0x1d7   :  { %v302_v29 = vpop.f32.mrf.mxu2 }
 0x1d8   :  { %v303_v30 = vadd.f32 %v302_v29, %v1446_v14 }
 0x1da   :  { %1128 = vtanh.f32 %v303_v30 }
 0x1df   :  { %v305_v31 = vpop.f32.mrf.mxu2 }
 0x1e0   :  { %v1129_v32 = vpop.eup %1128  ;;  %v306_v33 = vadd.f32 %v305_v31, %v1449_v5 }
 0x1e1   :  { %1045 = vmatmul.msk.f32.vlgmr.msrb.gmra.mxu3 %vm42_vm0, %v1129_v32 }
 0x1e2   :  { %1130 = vtanh.f32 %v306_v33  ;;  %705 = vmatpush.msrb.mxu3 %v1384_v56 }
 0x1e7   :  { %v308_v34 = vpop.f32.mrf.mxu2 }
 0x1e8   :  { %v1131_v35 = vpop.eup %1130  ;;  %v309_v36 = vadd.f32 %v308_v34, %v1454_v15 }
 0x1e9   :  { %1046 = vmatmul.msk.f32.gmra.mxu3 %vm42_vm0, %v1131_v35 }
 0x1ea   :  { %1132 = vtanh.f32 %v309_v36 }
 0x1ef   :  { %v311_v37 = vpop.f32.mrf.mxu2 }
 0x1f0   :  { %v1133_v38 = vpop.eup %1132  ;;  %v312_v39 = vadd.f32 %v311_v37, %v1458_v23 }
 0x1f1   :  { %1047 = vmatmul.msk.f32.gmra.mxu3 %vm42_vm0, %v1133_v38 }
 0x1f2   :  { %1134 = vtanh.f32 %v312_v39 }
 0x1f8   :  { %v1135_v40 = vpop.eup %1134 }
 0x1f9   :  { %1048 = vmatmul.msk.f32.gmra.mxu3 %vm42_vm0, %v1135_v40 }
 0x264   :  { %v347_v41 = vpop.f32.mrf.mxu3 }
 0x265   :  { %v348_v42 = vadd.f32 %v347_v41, %v1446_v14 }
 0x267   :  { %1136 = vtanh.f32 %v348_v42 }
 0x26c   :  { %v350_v43 = vpop.f32.mrf.mxu3 }
 0x26d   :  { %v1137_v44 = vpop.eup %1136  ;;  %v351_v45 = vadd.f32 %v350_v43, %v1449_v5 }
 0x26e   :  { %1049 = vmatmul.msk.f32.vlgmr.msrb.gmra.mxu0 %vm42_vm0, %v1137_v44 }
 0x26f   :  { %1138 = vtanh.f32 %v351_v45  ;;  %750 = vmatpush.msrb.mxu0 %v1384_v56 }
 0x274   :  { %v353_v46 = vpop.f32.mrf.mxu3 }
 0x275   :  { %v1139_v47 = vpop.eup %1138  ;;  %v354_v48 = vadd.f32 %v353_v46, %v1454_v15 }
 0x276   :  { %1050 = vmatmul.msk.f32.gmra.mxu0 %vm42_vm0, %v1139_v47 }
 0x277   :  { %1140 = vtanh.f32 %v354_v48 }
 0x27c   :  { %v356_v49 = vpop.f32.mrf.mxu3 }
 0x27d   :  { %v1141_v50 = vpop.eup %1140  ;;  %v357_v51 = vadd.f32 %v356_v49, %v1458_v23 }
 0x27e   :  { %1051 = vmatmul.msk.f32.gmra.mxu0 %vm42_vm0, %v1141_v50 }
 0x27f   :  { %1142 = vtanh.f32 %v357_v51 }
 0x285   :  { %v1143_v52 = vpop.eup %1142 }
 0x286   :  { %1052 = vmatmul.msk.f32.gmra.mxu0 %vm42_vm0, %v1143_v52 }
 0x2eb   :  { %v392_v53 = vpop.f32.mrf.mxu0 }
 0x2ec   :  { %v393_v54 = vadd.f32 %v392_v53, %v1446_v14 }
 0x2ee   :  { %1144 = vtanh.f32 %v393_v54 }
 0x2f3   :  { %v395_v55 = vpop.f32.mrf.mxu0 }
 0x2f4   :  { %v1145_v57 = vpop.eup %1144  ;;  %v396_v58 = vadd.f32 %v395_v55, %v1449_v5 }
 0x2f5   :  { %1053 = vmatmul.msk.f32.vlgmr.msrb.gmra.mxu1 %vm42_vm0, %v1145_v57 }
 0x2f6   :  { %1146 = vtanh.f32 %v396_v58  ;;  %795 = vmatpush.msrb.mxu1 %v1384_v56 }
 0x2fb   :  { %v398_v59 = vpop.f32.mrf.mxu0 }
 0x2fc   :  { %v1147_v60 = vpop.eup %1146  ;;  %v399_v61 = vadd.f32 %v398_v59, %v1454_v15 }
 0x2fd   :  { %1054 = vmatmul.msk.f32.gmra.mxu1 %vm42_vm0, %v1147_v60 }
 0x2fe   :  { %1148 = vtanh.f32 %v399_v61 }
 0x303   :  { %v401_v62 = vpop.f32.mrf.mxu0 }
 0x304   :  { %v1149_v3 = vpop.eup %1148  ;;  %v402_v6 = vadd.f32 %v401_v62, %v1458_v23 }
 0x305   :  { %1055 = vmatmul.msk.f32.gmra.mxu1 %vm42_vm0, %v1149_v3 }
 0x306   :  { %1150 = vtanh.f32 %v402_v6 }
 0x30c   :  { %v1151_v7 = vpop.eup %1150 }
 0x30d   :  { %1056 = vmatmul.msk.f32.gmra.mxu1 %vm42_vm0, %v1151_v7 }
 0x372   :  { %v437_v8 = vpop.f32.mrf.mxu1 }
 0x373   :  { %v438_v9 = vadd.f32 %v437_v8, %v1446_v14 }
 0x375   :  { %1152 = vtanh.f32 %v438_v9 }
 0x37a   :  { %v440_v10 = vpop.f32.mrf.mxu1 }
 0x37b   :  { %v1153_v0 = vpop.eup %1152  ;;  %v441_v11 = vadd.f32 %v440_v10, %v1449_v5 }
 0x37c   :  { %1057 = vmatmul.msk.f32.vlgmr.msrb.gmra.mxu2 %vm42_vm0, %v1153_v0 }
 0x37d   :  { %1154 = vtanh.f32 %v441_v11  ;;  %840 = vmatpush.msrb.mxu2 %v1384_v56 }
 0x382   :  { %v443_v2 = vpop.f32.mrf.mxu1 }
 0x383   :  { %v1155_v12 = vpop.eup %1154  ;;  %v444_v13 = vadd.f32 %v443_v2, %v1454_v15 }
 0x384   :  { %1058 = vmatmul.msk.f32.gmra.mxu2 %vm42_vm0, %v1155_v12 }
 0x385   :  { %1156 = vtanh.f32 %v444_v13 }
 0x38a   :  { %v446_v17 = vpop.f32.mrf.mxu1 }
 0x38b   :  { %v1157_v18 = vpop.eup %1156  ;;  %v447_v1 = vadd.f32 %v446_v17, %v1458_v23 }
 0x38c   :  { %1059 = vmatmul.msk.f32.gmra.mxu2 %vm42_vm0, %v1157_v18 }
 0x38d   :  { %1158 = vtanh.f32 %v447_v1 }
 0x393   :  { %v1159_v19 = vpop.eup %1158 }
 0x394   :  { %1060 = vmatmul.msk.f32.gmra.mxu2 %vm42_vm0, %v1159_v19 }
 0x3ff   :  { %v482_v20 = vpop.f32.mrf.mxu2 }
 0x400   :  { %v483_v4 = vadd.f32 %v482_v20, %v1446_v14 }
 0x402   :  { %1160 = vtanh.f32 %v483_v4 }
 0x407   :  { %v485_v63 = vpop.f32.mrf.mxu2 }
 0x408   :  { %v1161_v21 = vpop.eup %1160  ;;  %v486_v22 = vadd.f32 %v485_v63, %v1449_v5 }
 0x409   :  { %1061 = vmatmul.msk.f32.vlgmr.msra.gmra.mxu3 %vm42_vm0, %v1161_v21 }
 0x40a   :  { %1162 = vtanh.f32 %v486_v22  ;;  %885 = vmatpush.msra.mxu3 %v1384_v56 }
 0x40f   :  { %v488_v16 = vpop.f32.mrf.mxu2 }
 0x410   :  { %v1163_v24 = vpop.eup %1162  ;;  %v489_v25 = vadd.f32 %v488_v16, %v1454_v15 }
 0x411   :  { %1062 = vmatmul.msk.f32.gmra.mxu3 %vm42_vm0, %v1163_v24 }
 0x412   :  { %1164 = vtanh.f32 %v489_v25 }
 0x417   :  { %v491_v26 = vpop.f32.mrf.mxu2 }
 0x418   :  { %v1165_v27 = vpop.eup %1164  ;;  %v492_v28 = vadd.f32 %v491_v26, %v1458_v23 }
 0x419   :  { %1063 = vmatmul.msk.f32.gmra.mxu3 %vm42_vm0, %v1165_v27 }
 0x41a   :  { %1166 = vtanh.f32 %v492_v28 }
 0x420   :  { %v1167_v29 = vpop.eup %1166 }
 0x421   :  { %1064 = vmatmul.msk.f32.gmra.mxu3 %vm42_vm0, %v1167_v29 }
 0x48c   :  { %v527_v30 = vpop.f32.mrf.mxu3 }
 0x48d   :  { %v528_v31 = vadd.f32 %v527_v30, %v1446_v14 }
 0x48f   :  { %1168 = vtanh.f32 %v528_v31 }
 0x494   :  { %v530_v32 = vpop.f32.mrf.mxu3 }
 0x495   :  { %v1169_v33 = vpop.eup %1168  ;;  %v531_v34 = vadd.f32 %v530_v32, %v1449_v5 }
 0x496   :  { %1065 = vmatmul.msk.f32.vlgmr.msra.gmra.mxu0 %vm42_vm0, %v1169_v33 }
 0x497   :  { %1170 = vtanh.f32 %v531_v34  ;;  %930 = vmatpush.msra.mxu0 %v1384_v56 }
 0x49c   :  { %v533_v35 = vpop.f32.mrf.mxu3 }
 0x49d   :  { %v1171_v36 = vpop.eup %1170  ;;  %v534_v37 = vadd.f32 %v533_v35, %v1454_v15 }
 0x49e   :  { %1066 = vmatmul.msk.f32.gmra.mxu0 %vm42_vm0, %v1171_v36 }
 0x49f   :  { %1172 = vtanh.f32 %v534_v37 }
 0x4a4   :  { %v536_v38 = vpop.f32.mrf.mxu3 }
 0x4a5   :  { %v1173_v39 = vpop.eup %1172  ;;  %v537_v40 = vadd.f32 %v536_v38, %v1458_v23 }
 0x4a6   :  { %1067 = vmatmul.msk.f32.gmra.mxu0 %vm42_vm0, %v1173_v39 }
 0x4a7   :  { %1174 = vtanh.f32 %v537_v40 }
 0x4ad   :  { %v1175_v41 = vpop.eup %1174 }
 0x4ae   :  { %1068 = vmatmul.msk.f32.gmra.mxu0 %vm42_vm0, %v1175_v41 }
 0x513   :  { %v572_v42 = vpop.f32.mrf.mxu0 }
 0x514   :  { %v573_v56 = vadd.f32 %v572_v42, %v1446_v14 }
 0x516   :  { %1176 = vtanh.f32 %v573_v56 }
 0x51b   :  { %v575_v43 = vpop.f32.mrf.mxu0 }
 0x51c   :  { %v1177_v44 = vpop.eup %1176  ;;  %v576_v45 = vadd.f32 %v575_v43, %v1449_v5 }
 0x51d   :  { %1069 = vmatmul.msk.f32.vlgmr.msra.gmra.mxu1 %vm42_vm0, %v1177_v44 }
 0x51e   :  { %1178 = vtanh.f32 %v576_v45 }
 0x523   :  { %v578_v46 = vpop.f32.mrf.mxu0 }
 0x524   :  { %v1179_v47 = vpop.eup %1178  ;;  %v579_v48 = vadd.f32 %v578_v46, %v1454_v15 }
 0x525   :  { %1070 = vmatmul.msk.f32.gmra.mxu1 %vm42_vm0, %v1179_v47 }
 0x526   :  { %1180 = vtanh.f32 %v579_v48 }
 0x52b   :  { %v581_v49 = vpop.f32.mrf.mxu0 }
 0x52c   :  { %v1181_v50 = vpop.eup %1180  ;;  %v582_v51 = vadd.f32 %v581_v49, %v1458_v23 }
 0x52d   :  { %1071 = vmatmul.msk.f32.gmra.mxu1 %vm42_vm0, %v1181_v50 }
 0x52e   :  { %1182 = vtanh.f32 %v582_v51 }
 0x534   :  { %v1183_v52 = vpop.eup %1182 }
 0x535   :  { %1072 = vmatmul.msk.f32.gmra.mxu1 %vm42_vm0, %v1183_v52 }
 0x59a   :  { %v617_v53 = vpop.f32.mrf.mxu1 }
 0x59b   :  { %v618_v54 = vadd.f32 %v617_v53, %v1446_v14 }
 0x59d   :  { %1184 = vtanh.f32 %v618_v54 }
 0x5a2   :  { %v620_v55 = vpop.f32.mrf.mxu1 }
 0x5a3   :  { %v1185_v57 = vpop.eup %1184  ;;  %v621_v58 = vadd.f32 %v620_v55, %v1449_v5 }
 0x5a4   :  { %1073 = vmatmul.msk.f32.vlgmr.msra.gmra.mxu2 %vm42_vm0, %v1185_v57 }
 0x5a5   :  { %1186 = vtanh.f32 %v621_v58 }
 0x5aa   :  { %v623_v59 = vpop.f32.mrf.mxu1 }
 0x5ab   :  { %v1187_v60 = vpop.eup %1186  ;;  %v624_v61 = vadd.f32 %v623_v59, %v1454_v15 }
 0x5ac   :  { %1074 = vmatmul.msk.f32.gmra.mxu2 %vm42_vm0, %v1187_v60 }
 0x5ad   :  { %1188 = vtanh.f32 %v624_v61 }
 0x5b2   :  { %v626_v62 = vpop.f32.mrf.mxu1 }
 0x5b3   :  { %v1189_v3 = vpop.eup %1188  ;;  %v627_v6 = vadd.f32 %v626_v62, %v1458_v23 }
 0x5b4   :  { %1075 = vmatmul.msk.f32.gmra.mxu2 %vm42_vm0, %v1189_v3 }
 0x5b5   :  { %1190 = vtanh.f32 %v627_v6 }
 0x5bb   :  { %v1191_v7 = vpop.eup %1190 }
 0x5bc   :  { %1076 = vmatmul.msk.f32.gmra.mxu2 %vm42_vm0, %v1191_v7 }
 0x627   :  { %v662_v8 = vpop.f32.mrf.mxu2 }
 0x628   :  { %v663_v9 = vadd.f32 %v662_v8, %v1446_v14 }
 0x62a   :  { %1192 = vtanh.f32 %v663_v9 }
 0x62f   :  { %v665_v10 = vpop.f32.mrf.mxu2 }
 0x630   :  { %v1193_v0 = vpop.eup %1192  ;;  %v666_v11 = vadd.f32 %v665_v10, %v1449_v5 }
 0x631   :  { %1077 = vmatmul.msk.f32.vlgmr.msrb.gmra.mxu3 %vm42_vm0, %v1193_v0 }
 0x632   :  { %1194 = vtanh.f32 %v666_v11 }
 0x637   :  { %v668_v2 = vpop.f32.mrf.mxu2 }
 0x638   :  { %v1195_v12 = vpop.eup %1194  ;;  %v669_v13 = vadd.f32 %v668_v2, %v1454_v15 }
 0x639   :  { %1078 = vmatmul.msk.f32.gmra.mxu3 %vm42_vm0, %v1195_v12 }
 0x63a   :  { %1196 = vtanh.f32 %v669_v13 }
 0x63f   :  { %v671_v17 = vpop.f32.mrf.mxu2 }
 0x640   :  { %v1197_v18 = vpop.eup %1196  ;;  %v672_v1 = vadd.f32 %v671_v17, %v1458_v23 }
 0x641   :  { %1079 = vmatmul.msk.f32.gmra.mxu3 %vm42_vm0, %v1197_v18 }
 0x642   :  { %1198 = vtanh.f32 %v672_v1 }
 0x648   :  { %v1199_v19 = vpop.eup %1198 }
 0x649   :  { %1080 = vmatmul.msk.f32.gmra.mxu3 %vm42_vm0, %v1199_v19 }
 0x6b4   :  { %v707_v20 = vpop.f32.mrf.mxu3 }
 0x6b5   :  { %v708_v4 = vadd.f32 %v707_v20, %v1446_v14 }
 0x6b7   :  { %1200 = vtanh.f32 %v708_v4 }
 0x6bc   :  { %v710_v63 = vpop.f32.mrf.mxu3 }
 0x6bd   :  { %v1201_v21 = vpop.eup %1200  ;;  %v711_v22 = vadd.f32 %v710_v63, %v1449_v5 }
 0x6be   :  { %1081 = vmatmul.msk.f32.vlgmr.msrb.gmra.mxu0 %vm42_vm0, %v1201_v21 }
 0x6bf   :  { %1202 = vtanh.f32 %v711_v22 }
 0x6c4   :  { %v713_v16 = vpop.f32.mrf.mxu3 }
 0x6c5   :  { %v1203_v24 = vpop.eup %1202  ;;  %v714_v25 = vadd.f32 %v713_v16, %v1454_v15  ;;  %v977_v16 = vld [vmem:[%s1619_s5] sm:$0xff] }
 0x6c6   :  { %1082 = vmatmul.msk.f32.gmra.mxu0 %vm42_vm0, %v1203_v24  ;;  %1000 = vmatpush.msra.mxu2 %v977_v16 }
 0x6c7   :  { %1204 = vtanh.f32 %v714_v25 }
 0x6cc   :  { %v716_v26 = vpop.f32.mrf.mxu3 }
 0x6cd   :  { %v1205_v27 = vpop.eup %1204  ;;  %v717_v28 = vadd.f32 %v716_v26, %v1458_v23 }
 0x6ce   :  { %1083 = vmatmul.msk.f32.gmra.mxu0 %vm42_vm0, %v1205_v27 }
 0x6cf   :  { %1206 = vtanh.f32 %v717_v28 }
 0x6d5   :  { %v1207_v29 = vpop.eup %1206 }
 0x6d6   :  { %1084 = vmatmul.msk.f32.gmra.mxu0 %vm42_vm0, %v1207_v29  ;;  %v1107_v29 = vld [vmem:[%s1620_s6] ss:$0 sm:$0xff] }
 0x73b   :  { %v752_v30 = vpop.f32.mrf.mxu0 }
 0x73c   :  { %v753_v31 = vadd.f32 %v752_v30, %v1446_v14 }
 0x73e   :  { %1208 = vtanh.f32 %v753_v31 }
 0x743   :  { %v755_v32 = vpop.f32.mrf.mxu0 }
 0x744   :  { %v1209_v33 = vpop.eup %1208  ;;  %v756_v34 = vadd.f32 %v755_v32, %v1449_v5 }
 0x745   :  { %1085 = vmatmul.msk.f32.vlgmr.msrb.gmra.mxu1 %vm42_vm0, %v1209_v33 }
 0x746   :  { %1210 = vtanh.f32 %v756_v34 }
 0x74b   :  { %v758_v35 = vpop.f32.mrf.mxu0 }
 0x74c   :  { %v1211_v36 = vpop.eup %1210  ;;  %v759_v37 = vadd.f32 %v758_v35, %v1454_v15 }
 0x74d   :  { %1086 = vmatmul.msk.f32.gmra.mxu1 %vm42_vm0, %v1211_v36 }
 0x74e   :  { %1212 = vtanh.f32 %v759_v37 }
 0x753   :  { %v761_v38 = vpop.f32.mrf.mxu0 }
 0x754   :  { %v1213_v39 = vpop.eup %1212  ;;  %v762_v40 = vadd.f32 %v761_v38, %v1458_v23 }
 0x755   :  { %1087 = vmatmul.msk.f32.gmra.mxu1 %vm42_vm0, %v1213_v39 }
 0x756   :  { %1214 = vtanh.f32 %v762_v40 }
 0x75c   :  { %v1215_v41 = vpop.eup %1214 }
 0x75d   :  { %1088 = vmatmul.msk.f32.gmra.mxu1 %vm42_vm0, %v1215_v41 }
 0x7c2   :  { %v797_v42 = vpop.f32.mrf.mxu1 }
 0x7c3   :  { %v798_v56 = vadd.f32 %v797_v42, %v1446_v14 }
 0x7c5   :  { %1216 = vtanh.f32 %v798_v56 }
 0x7ca   :  { %v800_v43 = vpop.f32.mrf.mxu1 }
 0x7cb   :  { %v1217_v44 = vpop.eup %1216  ;;  %v801_v45 = vadd.f32 %v800_v43, %v1449_v5 }
 0x7cc   :  { %1089 = vmatmul.msk.f32.vlgmr.msrb.gmra.mxu2 %vm42_vm0, %v1217_v44 }
 0x7cd   :  { %1218 = vtanh.f32 %v801_v45 }
 0x7d2   :  { %v803_v46 = vpop.f32.mrf.mxu1 }
 0x7d3   :  { %v1219_v47 = vpop.eup %1218  ;;  %v804_v48 = vadd.f32 %v803_v46, %v1454_v15 }
 0x7d4   :  { %1090 = vmatmul.msk.f32.gmra.mxu2 %vm42_vm0, %v1219_v47 }
 0x7d5   :  { %1220 = vtanh.f32 %v804_v48 }
 0x7da   :  { %v806_v49 = vpop.f32.mrf.mxu1 }
 0x7db   :  { %v1221_v50 = vpop.eup %1220  ;;  %v807_v51 = vadd.f32 %v806_v49, %v1458_v23 }
 0x7dc   :  { %1091 = vmatmul.msk.f32.gmra.mxu2 %vm42_vm0, %v1221_v50 }
 0x7dd   :  { %1222 = vtanh.f32 %v807_v51 }
 0x7e3   :  { %v1223_v52 = vpop.eup %1222 }
 0x7e4   :  { %1092 = vmatmul.msk.f32.gmra.mxu2 %vm42_vm0, %v1223_v52 }
 0x84f   :  { %v842_v53 = vpop.f32.mrf.mxu2 }
 0x850   :  { %v843_v54 = vadd.f32 %v842_v53, %v1446_v14 }
 0x852   :  { %1224 = vtanh.f32 %v843_v54 }
 0x857   :  { %v845_v55 = vpop.f32.mrf.mxu2 }
 0x858   :  { %v1225_v57 = vpop.eup %1224  ;;  %v846_v58 = vadd.f32 %v845_v55, %v1449_v5 }
 0x859   :  { %1093 = vmatmul.msk.f32.vlgmr.msra.gmra.mxu3 %vm42_vm0, %v1225_v57 }
 0x85a   :  { %1226 = vtanh.f32 %v846_v58 }
 0x85f   :  { %v848_v59 = vpop.f32.mrf.mxu2 }
 0x860   :  { %v1227_v60 = vpop.eup %1226  ;;  %v849_v61 = vadd.f32 %v848_v59, %v1454_v15 }
 0x861   :  { %1094 = vmatmul.msk.f32.gmra.mxu3 %vm42_vm0, %v1227_v60 }
 0x862   :  { %1228 = vtanh.f32 %v849_v61 }
 0x867   :  { %v851_v62 = vpop.f32.mrf.mxu2 }
 0x868   :  { %v1229_v3 = vpop.eup %1228  ;;  %v852_v6 = vadd.f32 %v851_v62, %v1458_v23 }
 0x869   :  { %1095 = vmatmul.msk.f32.gmra.mxu3 %vm42_vm0, %v1229_v3 }
 0x86a   :  { %1230 = vtanh.f32 %v852_v6 }
 0x870   :  { %v1231_v7 = vpop.eup %1230 }
 0x871   :  { %1096 = vmatmul.msk.f32.gmra.mxu3 %vm42_vm0, %v1231_v7 }
 0x8dc   :  { %v887_v8 = vpop.f32.mrf.mxu3 }
 0x8dd   :  { %v888_v9 = vadd.f32 %v887_v8, %v1446_v14 }
 0x8df   :  { %1232 = vtanh.f32 %v888_v9 }
 0x8e4   :  { %v890_v10 = vpop.f32.mrf.mxu3 }
 0x8e5   :  { %v1233_v0 = vpop.eup %1232  ;;  %v891_v11 = vadd.f32 %v890_v10, %v1449_v5 }
 0x8e6   :  { %1097 = vmatmul.msk.f32.vlgmr.msra.gmra.mxu0 %vm42_vm0, %v1233_v0 }
 0x8e7   :  { %1234 = vtanh.f32 %v891_v11 }
 0x8ec   :  { %v893_v2 = vpop.f32.mrf.mxu3 }
 0x8ed   :  { %v1235_v12 = vpop.eup %1234  ;;  %v894_v13 = vadd.f32 %v893_v2, %v1454_v15 }
 0x8ee   :  { %1098 = vmatmul.msk.f32.gmra.mxu0 %vm42_vm0, %v1235_v12 }
 0x8ef   :  { %1236 = vtanh.f32 %v894_v13 }
 0x8f4   :  { %v896_v17 = vpop.f32.mrf.mxu3 }
 0x8f5   :  { %v1237_v18 = vpop.eup %1236  ;;  %v897_v1 = vadd.f32 %v896_v17, %v1458_v23 }
 0x8f6   :  { %1099 = vmatmul.msk.f32.gmra.mxu0 %vm42_vm0, %v1237_v18 }
 0x8f7   :  { %1238 = vtanh.f32 %v897_v1 }
 0x8fd   :  { %v1239_v19 = vpop.eup %1238 }
 0x8fe   :  { %1100 = vmatmul.msk.f32.gmra.mxu0 %vm42_vm0, %v1239_v19 }
 0x963   :  { %v932_v20 = vpop.f32.mrf.mxu0 }
 0x964   :  { %v933_v4 = vadd.f32 %v932_v20, %v1446_v14 }
 0x966   :  { %1240 = vtanh.f32 %v933_v4 }
 0x96b   :  { %v935_v63 = vpop.f32.mrf.mxu0 }
 0x96c   :  { %v1241_v21 = vpop.eup %1240  ;;  %v936_v22 = vadd.f32 %v935_v63, %v1449_v5 }
 0x96d   :  { %948 = vst.msk [vmem:[%s1622_s8] sm:$0xff] %vm42_vm0, %v1241_v21 }
 0x96e   :  { %1242 = vtanh.f32 %v936_v22 }
 0x973   :  { %v938_v24 = vpop.f32.mrf.mxu0 }
 0x974   :  { %v1243_v25 = vpop.eup %1242  ;;  %v939_v14 = vadd.f32 %v938_v24, %v1454_v15  ;;  %v952_v15 = vld [vmem:[%s1621_s7] sm:$0x3] }
 0x975   :  { %949 = vst.msk [vmem:[%s1622_s8 + $0x8] sm:$0xff] %vm42_vm0, %v1243_v25 }
 0x976   :  { %1244 = vtanh.f32 %v939_v14 }
 0x97b   :  { %v941_v5 = vpop.f32.mrf.mxu0 }
 0x97c   :  { %v1245_v26 = vpop.eup %1244  ;;  %v942_v27 = vadd.f32 %v941_v5, %v1458_v23 }
 0x97d   :  { %950 = vst.msk [vmem:[%s1622_s8 + $0x10] sm:$0xff] %vm42_vm0, %v1245_v26 }
 0x97e   :  { %1246 = vtanh.f32 %v942_v27 }
 0x984   :  { %v1247_v28 = vpop.eup %1246 }
 0x985   :  { %951 = vst.msk [vmem:[%s1622_s8 + $0x18] sm:$0xff] %vm42_vm0, %v1247_v28  ;;  %969 = vmatpush.msra.mxu1 %v1247_v28 }
 0x987   :  { %970 = vmatpush.msra.mxu1 %v1245_v26 }
 0x989   :  { %971 = vmatpush.msra.mxu1 %v1243_v25 }
 0x98b   :  { %972 = vmatpush.msra.mxu1 %v1241_v21 }
 0x98c   :  { %1101 = vmatmul.msk.f32.vlgmr.msra.gmra.mxu1 %vm953_vm9, %v952_v15 }
 0xa09   :  { %v974_v23 = vpop.f32.mrf.mxu1 }
 0xa0a   :  { %1102 = vmatmul.msk.f32.vlgmr.msra.gmra.mxu2 %vm42_vm0, %v974_v23 }
 0xa8d   :  { %v1002_v30 = vpop.f32.mrf.mxu2 }
 0xa8e   :  { %v1003_v31 = vadd.f32 %v1107_v29, %v1002_v30 }
 0xa90   :  { %1006 = vst.msk [vmem:[#allocation2] sm:$0x3] %vm1005_vm10, %v1003_v31 }
 0xa91   :  { %1019 = dma.vmem_to_hbm [thread:$0]  %s1015_s18, 32, %s1017_s2, [#allocation3]  }
 0xa92   :  { %1272 = dma.done.wait [#allocation3], 32  }
 0xa93   :  { %1273 = vsyncadd [#allocation3], 4294967264 }
 0xa94   :  { %1026 = vsyncpa [#allocation3], 1 }

</bundles_post_ra>
